<compile_context>
chip_gen: v7x
topology: tpu7x:2x2x1
jax: 0.10.0
libtpu: 0.0.40
codegen_flags: <defaults>
</compile_context>

<pallas_src>
import jax
import jax.numpy as jnp
from jax.experimental import pallas as pl
from jax.experimental.pallas import tpu as pltpu

INPUT_SIZE = 5        # forced by the module's .view(5, 5)
NUM_LAYER = 3
LANE = 128            # TPU lane width (output N padded to this)
SUBLANE = 8
FEAT = 2 * INPUT_SIZE * INPUT_SIZE      # 50 real input features
FEAT_PAD = 56                           # 50 data + 1 ones column + 5 zero pad


def _round_up(n, m):
    return (n + m - 1) // m * m


def _pred_matrix_kernel(x_ref, w_ref, out_ref):
    # x_ref  : (TM, FEAT_PAD)     activations, col FEAT==1.0 (bias), rest-pad 0
    # w_ref  : (FEAT_PAD, LANE)   folded weight, row FEAT = folded bias
    # out_ref: (TM, LANE)         lane-dense output (25 valid columns)
    out_ref[...] = jnp.dot(
        x_ref[...], w_ref[...], preferred_element_type=jnp.float32)


def pred_matrix_batched(x, w_aug, *, tm=512):
    """x: (B, 2, S, S) NCHW float32 -> (B, S, S) float32."""
    S = INPUT_SIZE
    B = x.shape[0]
    x_flat = x.reshape(B, FEAT).astype(jnp.float32)

    # Pad batch rows to a sublane multiple, pick an M-tile, and make the
    # padded row count an exact multiple of the tile.
    b_rows = _round_up(max(B, 1), SUBLANE)
    tm = min(tm, b_rows)
    # v7x: once the batch is big enough for two >=512-row tiles, make sure
    # the grid has >= 2 parallel steps so both TensorCores get work.
    if b_rows >= 2 * 512:
        tm = min(tm, _round_up(b_rows // 2, SUBLANE))
    b_rows = _round_up(b_rows, tm)

    # Narrow (K = FEAT_PAD) activation slab: real data in [:, :FEAT], a
    # constant-1 column at FEAT (bias row of W), zeros elsewhere.  Zero pad
    # columns x zero W rows keep the dot exact.
    x_slab = (
        jnp.zeros((b_rows, FEAT_PAD), jnp.float32)
        .at[:B, :FEAT].set(x_flat)
        .at[:B, FEAT].set(1.0)
    )

    grid = (b_rows // tm,)
    out = pl.pallas_call(
        _pred_matrix_kernel,
        out_shape=jax.ShapeDtypeStruct((b_rows, LANE), jnp.float32),
        grid=grid,
        in_specs=[
            pl.BlockSpec((tm, FEAT_PAD), lambda i: (i, 0)),      # activations
            pl.BlockSpec((FEAT_PAD, LANE), lambda i: (0, 0)),    # folded W+b
        ],
        out_specs=pl.BlockSpec((tm, LANE), lambda i: (i, 0)),
        compiler_params=pltpu.CompilerParams(
            dimension_semantics=("parallel",)),
        cost_estimate=pl.CostEstimate(
            flops=2 * b_rows * FEAT_PAD * LANE,
            transcendentals=0,
            bytes_accessed=4 * (b_rows * FEAT_PAD
                                + FEAT_PAD * LANE
                                + b_rows * LANE)),
    )(x_slab, w_aug)

    # NOTE: this slice/reshape is an extra pass over the output; callers that
    # keep computing on-device could consume the padded (B, 128) slab instead.
    return out[:B, :S * S].reshape(B, S, S)


def pred_matrix_forward(x, w_aug):
    """Module-exact semantics: x (1, 2, S, S) -> (S, S), like torch .view(5,5)."""
    return pred_matrix_batched(x, w_aug)[0]


def init_params(key, num_layer=NUM_LAYER, input_size=INPUT_SIZE):
    """Per-layer parameters with the shapes the PyTorch Conv2d layers have,
    already flattened/transposed to dense `h @ W + b` form."""
    S = input_size
    keys = jax.random.split(key, 2 * num_layer + 2)

    # layer 0: Conv2d(2, S, kernel_size=S) -> W (S, 2, S, S), b (S,)
    w0_4d = jax.random.normal(keys[0], (S, 2, S, S), jnp.float32) * 0.1
    b0_1d = jax.random.normal(keys[1], (S,), jnp.float32) * 0.1
    w0 = w0_4d.reshape(S, 2 * S * S).T          # (2*S*S, S)
    b0 = b0_1d.reshape(1, S)

    # layers 1..num_layer-1: Conv2d(S, S, 1) -> W (S, S, 1, 1), b (S,)
    whs, bhs = [], []
    for i in range(1, num_layer):
        w = jax.random.normal(keys[2 * i], (S, S, 1, 1), jnp.float32) * 0.1
        b = jax.random.normal(keys[2 * i + 1], (S,), jnp.float32) * 0.1
        whs.append(w[:, :, 0, 0].T)             # (S, S)
        bhs.append(b.reshape(1, S))

    # xcor_conv: Conv2d(S, S*S, 1) -> W (S*S, S, 1, 1), b (S*S,)
    wx_4d = jax.random.normal(keys[-2], (S * S, S, 1, 1), jnp.float32) * 0.1
    bx_1d = jax.random.normal(keys[-1], (S * S,), jnp.float32) * 0.1
    wx = wx_4d[:, :, 0, 0].T                    # (S, S*S)
    bx = bx_1d.reshape(1, S * S)

    return (w0, b0, whs, bhs, wx, bx)


def fold_params(params):
    """Host-side affine-chain folding into a single augmented matrix:
         W_total = w0 @ wh[0] @ ... @ wx                     (50, 25)
         b_total = ((b0 @ wh[0] + bh[0]) ... ) @ wx + bx     (1, 25)
       packed as rows [0:50] = W_total, row 50 = b_total of a lane-dense,
       zero-padded (FEAT_PAD, 128) f32 slab."""
    w0, b0, whs, bhs, wx, bx = params
    S = INPUT_SIZE

    w_total = w0
    b_total = b0
    for wh, bh in zip(whs, bhs):
        w_total = w_total @ wh
        b_total = b_total @ wh + bh
    w_total = w_total @ wx                      # (FEAT, S*S)
    b_total = b_total @ wx + bx                 # (1, S*S)

    w_aug = (
        jnp.zeros((FEAT_PAD, LANE), jnp.float32)
        .at[:FEAT, :S * S].set(w_total)
        .at[FEAT, :S * S].set(b_total[0])
    )
    return w_aug


def reference_forward(x, params):
    """Pure-JAX per-layer reference of the original module's math."""
    w0, b0, whs, bhs, wx, bx = params
    B = x.shape[0]
    h = x.reshape(B, -1) @ w0 + b0
    for wh, bh in zip(whs, bhs):
        h = h @ wh + bh
    o = h @ wx + bx
    return o.reshape(B, INPUT_SIZE, INPUT_SIZE)


if __name__ == "__main__":
    key = jax.random.PRNGKey(0)
    kx, kb, kc, kp = jax.random.split(key, 4)

    params = init_params(kp)
    w_aug = fold_params(params)

    # Module-exact case (shape dictated by the module): (1, 2, 5, 5) -> (5, 5)
    x1 = jax.random.normal(kx, (1, 2, INPUT_SIZE, INPUT_SIZE), jnp.float32)
    out1 = jax.block_until_ready(pred_matrix_forward(x1, w_aug))
    ref1 = reference_forward(x1, params)[0]
    assert out1.shape == (5, 5)
    assert jnp.allclose(out1, ref1, atol=1e-4, rtol=1e-4), "mismatch (single)"

    # Batched use of the same kernel (amortizes launch/DMA overhead).
    xb = jax.random.normal(kb, (16, 2, INPUT_SIZE, INPUT_SIZE), jnp.float32)
    outb = jax.block_until_ready(pred_matrix_batched(xb, w_aug))
    refb = reference_forward(xb, params)
    assert outb.shape == (16, 5, 5)
    assert jnp.allclose(outb, refb, atol=1e-4, rtol=1e-4), "mismatch (batched)"

    # Multi-tile grid path (small shapes, tm forced down to exercise grid > 1).
    xc = jax.random.normal(kc, (48, 2, INPUT_SIZE, INPUT_SIZE), jnp.float32)
    outc = jax.block_until_ready(pred_matrix_batched(xc, w_aug, tm=16))
    refc = reference_forward(xc, params)
    assert outc.shape == (48, 5, 5)
    assert jnp.allclose(outc, refc, atol=1e-4, rtol=1e-4), "mismatch (grid)"

    print("KERNEL_OK")
</pallas_src>

<mosaic_0001>
module attributes {stable_mosaic.version = 11 : i64} {
  func.func @_pred_matrix_kernel(%arg0: i32, %arg1: memref<8x56xf32, #tpu.memory_space<vmem>>, %arg2: memref<56x128xf32, #tpu.memory_space<vmem>>, %arg3: memref<8x128xf32, #tpu.memory_space<vmem>>) attributes {dimension_semantics = [#tpu.dimension_semantics<parallel>], iteration_bounds = array<i64: 1>, scalar_prefetch = 0 : i64, scratch_operands = 0 : i64, tpu.core_type = #tpu.core_type<tc>, window_params = [{transform_indices = @transform_0, window_bounds = array<i64: 8, 56>}, {pipeline_mode = #tpu.pipeline_mode<synchronous>, transform_indices = @transform_1, window_bounds = array<i64: 56, 128>}, {transform_indices = @transform_2, window_bounds = array<i64: 8, 128>}]} {
    %c0 = arith.constant 0 : index
    %c0_0 = arith.constant 0 : index
    %0 = vector.load %arg1[%c0, %c0_0] : memref<8x56xf32, #tpu.memory_space<vmem>>, vector<8x56xf32>
    %c0_1 = arith.constant 0 : index
    %c0_2 = arith.constant 0 : index
    %1 = vector.load %arg2[%c0_1, %c0_2] : memref<56x128xf32, #tpu.memory_space<vmem>>, vector<56x128xf32>
    %cst = arith.constant dense<0.000000e+00> : vector<8x128xf32>
    %2 = tpu.matmul %0, %1, %cst {dimension_numbers = #tpu.dot_dimension_numbers<[1], [0], [0], [1], [0, 0, 1, 1], [], []>} : vector<8x56xf32>, vector<56x128xf32>, vector<8x128xf32> -> vector<8x128xf32>
    %c0_3 = arith.constant 0 : index
    %c0_4 = arith.constant 0 : index
    %3 = vector.load %arg3[%c0_3, %c0_4] : memref<8x128xf32, #tpu.memory_space<vmem>>, vector<8x128xf32>
    tpu.vector_store %arg3[%c0_3, %c0_4], %2 {strides = array<i32>} : memref<8x128xf32, #tpu.memory_space<vmem>>, vector<8x128xf32>,
    return
  }
  func.func @transform_0(%arg0: i32) -> (i32, i32) {
    %c0_i32 = arith.constant 0 : i32
    %c0_i32_0 = arith.constant 0 : i32
    return %arg0, %c0_i32 : i32, i32
  }
  func.func @transform_1(%arg0: i32) -> (i32, i32) {
    %c0_i32 = arith.constant 0 : i32
    %c0_i32_0 = arith.constant 0 : i32
    %c0_i32_1 = arith.constant 0 : i32
    return %c0_i32, %c0_i32_0 : i32, i32
  }
  func.func @transform_2(%arg0: i32) -> (i32, i32) {
    %c0_i32 = arith.constant 0 : i32
    %c0_i32_0 = arith.constant 0 : i32
    return %arg0, %c0_i32 : i32, i32
  }
}

</mosaic_0001>

<bundles_post_ra>
// kernel: tpu_custom_call.1
= control target key start
LH: loop header
LB: loop body
LE: loop exit
PB: predicated region body
PF: predicated region fallthrough
CT: control target
= control target key end

     0   :  { %7 = vsyncpa [#allocation3], 0  ;;  %s318_s0 = inlined_call_operand.hbm [shape: f32[8,56], index: 0, kind: input, shape index: {}]   ;;  %s319_s1 = inlined_call_operand.hbm [shape: f32[56,128], index: 1, kind: input, shape index: {}]   ;;  %s320_s2 = inlined_call_operand.hbm [shape: f32[8,128], index: 2, kind: output, shape index: {}]  }
   0x1   :  { %8 = vsyncpa [#allocation6], 0 }
   0x2   :  { %9 = vsyncpa [#allocation4], 0  ;;  %s252_s9 = smov [#allocation2]   ;;  %s253_s11 = smov [#allocation5]  }
   0x3   :  { %s16_s10 = sshll.u32 %s252_s9, 4  ;;  %s25_s12 = sshll.u32 %s253_s11, 4  ;;  %s17_s10 = int_to_ptr.vmem [resolvable:$true] %s16_s10  ;;  %s275_s12 = int_to_ptr.vmem [resolvable:$true] %s25_s12 }
   0x4   :  { %s180_s15 = scalar_lea.hbm %s318_s0, 128 }
   0x5   :  { %p181_p0 = scmp.ne.s32.totalorder %s318_s0, %s180_s15  ;;  %p184_p1 = scmp.lt.u32.totalorder %s180_s15, %s318_s0 }
   0x7   :  { %p186_p2 = pnand %p184_p1, %p181_p0 }
   0x9   :  { %189 = shalt.err (!%p186_p2)
}
   0xa   :  { %s190_s20 = scalar_lea.vmem %s17_s10, 128  ;;  %p195_p4 = scmp.lt.s32.totalorder %s17_s10, %s17_s10 }
   0xb   :  { %p191_p3 = scmp.ne.s32.totalorder %s17_s10, %s190_s20  ;;  %p196_p5 = scmp.lt.s32.totalorder %s190_s20, %s190_s20 }
   0xd   :  { %p197_p6 = por %p196_p5, %p195_p4 }
   0xf   :  { %p198_p7 = pnand %p197_p6, %p191_p3 }
  0x11   :  { %201 = shalt.err (!%p198_p7)
}
  0x12   :  { %19 = dma.hbm_to_vmem [thread:$0]  %s318_s0, 128, %s17_s10, [#allocation3]  }
  0x13   :  { %s202_s25 = scalar_lea.hbm %s319_s1, 896 }
  0x14   :  { %p203_p8 = scmp.ne.s32.totalorder %s319_s1, %s202_s25  ;;  %p206_p9 = scmp.lt.u32.totalorder %s202_s25, %s319_s1 }
  0x16   :  { %p208_p10 = pnand %p206_p9, %p203_p8 }
  0x18   :  { %211 = shalt.err (!%p208_p10)
}
  0x19   :  { %s212_s30 = scalar_lea.vmem %s275_s12, 896  ;;  %p217_p12 = scmp.lt.s32.totalorder %s275_s12, %s275_s12 }
  0x1a   :  { %p213_p11 = scmp.ne.s32.totalorder %s275_s12, %s212_s30  ;;  %p218_p13 = scmp.lt.s32.totalorder %s212_s30, %s212_s30 }
  0x1c   :  { %p219_p0 = por %p218_p13, %p217_p12 }
  0x1e   :  { %p220_p1 = pnand %p219_p0, %p213_p11 }
  0x20   :  { %223 = shalt.err (!%p220_p1)
}
  0x21   :  { %s254_s0 = smov 128   ;;  %s255_s3 = smov 8  }
  0x22   :  { %31 = dma.hbm_to_vmem [thread:$0]  %s319_s1, 896, %s275_s12, [#allocation6], %s254_s0, %s254_s0, %s255_s3  }
  0x23   :  { %246 = dma.done.wait [#allocation3], 128  }
  0x24   :  { %247 = vsyncadd [#allocation3], 4294967168 }
  0x25   :  { %248 = dma.done.wait [#allocation6], 896  }
  0x26   :  { %249 = vsyncadd [#allocation6], 4294966400  ;;  %v256_v0 = vmov 0.0|0.0   ;;  %vm257_vm0 = vmmov 0   ;;  %v258_v1 = vmov 0.0   ;;  %v39_v2 = vld [vmem:[#allocation5] sm:$0xff] }
  0x27   :  { %163 = vmatprep.subr.bf16.mxu0 %v256_v0  ;;  %160 = vmatprep.mubr.msk.f32.mxu0 %vm257_vm0, %v258_v1  ;;  %v40_v3 = vld [vmem:[#allocation5 + $0x8] sm:$0xff]  ;;  %v41_v4 = vld [vmem:[#allocation5 + $0x10] sm:$0xff]  ;;  %v42_v6 = vld [vmem:[#allocation5 + $0x18] sm:$0xff]  ;;  %vm46_vm1 = vcmask 457728   ;;  %s259_s1 = smov [#allocation7]  }
  0x28   :  { %v164_v5 = vpack.c.bf16 %v40_v3, %v39_v2  ;;  %v167_v7 = vpack.c.bf16 %v42_v6, %v41_v4  ;;  %v43_v8 = vld [vmem:[#allocation5 + $0x20] sm:$0xff]  ;;  %v44_v9 = vld [vmem:[#allocation5 + $0x28] sm:$0xff]  ;;  %v45_v11 = vld [vmem:[#allocation5 + $0x30] sm:$0xff]  ;;  %s127_s6 = sshll.u32 %s259_s1, 4  ;;  %s128_s6 = int_to_ptr.vmem [resolvable:$true] %s127_s6 }
  0x29   :  { %v170_v10 = vpack.c.bf16 %v44_v9, %v43_v8  ;;  %v38_v12 = vld [vmem:[#allocation2] sm:$0xff]  ;;  %s224_s7 = scalar_lea.vmem %s128_s6, 128  ;;  %p229_p3 = scmp.lt.s32.totalorder %s128_s6, %s128_s6 }
  0x2a   :  { %165 = vmatpush3.bf16.msra.mxu0 %v164_v5  ;;  %p225_p2 = scmp.ne.s32.totalorder %s128_s6, %s224_s7  ;;  %p230_p4 = scmp.lt.s32.totalorder %s224_s7, %s224_s7 }
  0x2b   :  { %166 = vmatprep.subr.bf16.mxu0 %v256_v0 }
  0x2c   :  { %p231_p5 = por %p230_p4, %p229_p3 }
  0x2e   :  { %168 = vmatpush3.bf16.msra.mxu0 %v167_v7  ;;  %p232_p6 = pnand %p231_p5, %p225_p2 }
  0x2f   :  { %169 = vmatprep.subr.bf16.mxu0 %v256_v0 }
  0x32   :  { %171 = vmatpush3.bf16.msra.mxu0 %v170_v10 }
  0x33   :  { %158 = vmatprep.subr.mxu0 %v258_v1 }
  0x36   :  { %159 = vmatpush3.msra.mxu0 %v45_v11 }
  0x37   :  { %161 = vmatmul.mubr.msk.f32.vlgmr.msra.gmra.mrb[0].mxu0 %vm46_vm1, %v38_v12 }
 0x10a   :  { %v116_v13 = vpop.f32.mrb[0].mxu0 }
 0x10b   :  { %120 = vst [vmem:[#allocation7] sm:$0xff] %v116_v13  ;;  %v162_v14 = vpop.f32.mrb[1].mxu0 }
 0x10c   :  { %235 = shalt.err (!%p232_p6)
}
 0x10d   :  { %s236_s10 = scalar_lea.hbm %s320_s2, 128 }
 0x10e   :  { %p237_p7 = scmp.ne.s32.totalorder %s320_s2, %s236_s10  ;;  %p240_p8 = scmp.lt.u32.totalorder %s236_s10, %s320_s2 }
 0x110   :  { %p242_p9 = pnand %p240_p8, %p237_p7 }
 0x112   :  { %245 = shalt.err (!%p242_p9)
}
 0x113   :  { %130 = dma.vmem_to_hbm [thread:$0]  %s128_s6, 128, %s320_s2, [#allocation4]  }
 0x114   :  { %250 = dma.done.wait [#allocation4], 128  }
 0x115   :  { %251 = vsyncadd [#allocation4], 4294967168 }
 0x116   :  { %134 = vsyncpa [#allocation3], 1 }
 0x117   :  { %135 = vsyncpa [#allocation6], 1 }
 0x118   :  { %136 = vsyncpa [#allocation4], 1 }

</bundles_post_ra>
